<compile_context>
chip_gen: v7x
topology: tpu7x:2x2x1
jax: 0.10.0
libtpu: 0.0.40
codegen_flags: <defaults>
</compile_context>

<pallas_src>
import math
import functools

import jax
import jax.numpy as jnp
from jax.experimental import pallas as pl
from jax.experimental.pallas import tpu as pltpu


# ----------------------------- configuration -------------------------------
CFG = dict(
    discrete_dim=4,
    continuous_dim=3,
    num_tokens=8,
    disc_embedding_dim=16,
    cont_embedding_dim=32,
    t_emb_dim=32,
    hidden_dim=64,
    num_hidden_layers=2,   # use_residual_blocks=False path
    num_pred_layers=2,
)

LANES = 128                    # packed feature width (one f32 vreg lane span)
N_MATS = 9                     # 8 fused linear stages + 1 softmax group-sum matrix
N_BIAS = 8                     # 7 fused bias rows + 1 softmax-denominator bias row
WEIGHT_DTYPE = jnp.bfloat16    # MXU-friendly on v5e/v6e/v7x; f32 accumulate
BATCH_TILE = 128               # 8 grid steps at B=1024 -> pipelined, 4/core on v7x
NEG_BIG = -1.0e30              # finite "-inf" folded into the mask-token bias
SUM_EPS = 1.0e-35              # keeps the softmax denominator strictly positive


def _silu(x):
    return x * jax.nn.sigmoid(x)


def _layout(cfg):
    """Lane-layout checks; returns the lane where the discrete logits start."""
    cd, dd, nt = cfg["continuous_dim"], cfg["discrete_dim"], cfg["num_tokens"]
    ce, te = cfg["cont_embedding_dim"], cfg["t_emb_dim"]
    hd = cfg["hidden_dim"]
    disc_lo = ((cd + 7) // 8) * 8          # 8-aligned start for the logits block
    assert ce + te <= LANES                # fused projection/time streams fit
    assert cd + te + dd * nt <= LANES      # packed input (cont | t_sin | onehot) fits
    assert 2 * hd <= LANES                 # both head streams fit side by side
    assert disc_lo + dd * nt <= LANES      # packed output fits 128 lanes
    return disc_lo


# ------------------------------ fused kernel --------------------------------
def drift_kernel(x_ref, w_ref, b_ref, out_ref, *, dd, nt, disc_lo):
    """Fused matmul chain + masked per-group softmax.

    x_ref  : (TB, 128) f32   packed [x_cont | t_sin | onehot(disc) | 0]
    w_ref  : (9, 128, 128)   bf16 fused weight slab (W[8] = group-sum matrix)
    b_ref  : (8, 128) f32    fused bias slab (row 7 = softmax denom bias)
    out_ref: (TB, 128) f32   packed [cont_drift | ... | probs | ...]
    """
    bf = w_ref.dtype
    x = x_ref[...]
    bv = b_ref[...]
    x_bf = x.astype(bf)                    # cast once (feeds dots 0 and 3)

    def dot(a_bf, wi):
        # bf16 at the MXU, f32 accumulate; elementwise math stays f32.
        return jnp.dot(a_bf, w_ref[wi], preferred_element_type=jnp.float32)

    # fused continuous_projection / time_embedding: Linear -> SiLU -> Linear
    z = _silu(dot(x_bf, 0) + bv[0:1, :]).astype(bf)
    pre = (dot(z, 1) + bv[1:2, :]).astype(bf)            # [c_emb | t_emb | 0...]

    # trunk layer 1: cat([c_emb, disc_emb, t_emb]) @ wm1 as two partial matmuls
    # (pre carries c_emb/t_emb, x still carries the one-hot disc ids; the
    #  embedding table is pre-multiplied into W[3] host-side) -> no concat.
    h = _silu(dot(pre, 2) + dot(x_bf, 3) + bv[2:3, :]).astype(bf)
    # trunk layer 2
    h = _silu(dot(h, 4) + bv[3:4, :]).astype(bf)

    # fused prediction heads (cont stream lanes [0,64), disc stream [64,128))
    h = _silu(dot(h, 5) + bv[4:5, :]).astype(bf)         # [wh1 | wd1]
    h = _silu(dot(h, 6) + bv[5:6, :]).astype(bf)         # block-diag [wh2, wd2]
    raw = dot(h, 7) + bv[6:7, :]                         # cont drift @ [0,cd),
                                                         # logits @ [disc_lo, disc_hi)
                                                         # (mask-token bias = -1e30)

    # ---- masked softmax over each group of nt token lanes -------------------
    disc_hi = disc_lo + dd * nt
    col = jax.lax.broadcasted_iota(jnp.int32, (1, LANES), 1)   # (1,128) masks only
    in_disc = (col >= disc_lo) & (col < disc_hi)

    # one row-wide max (mask-token lanes already carry -1e30 via the bias)
    gmax = jnp.max(jnp.where(in_disc, raw, NEG_BIG), axis=-1, keepdims=True)
    e = jnp.exp(jnp.where(in_disc, raw - gmax, NEG_BIG))       # 0 outside groups

    # per-group sums on the MXU: W[8] is a 0/1 block matrix (one block per
    # token group); bias row 7 is 1.0 off-disc / 1e-35 on-disc (no 0*inf NaN).
    gsum = dot(e.astype(bf), 8) + bv[7:8, :]
    probs = e * pl.reciprocal(gsum, approx=True)
    out_ref[...] = jnp.where(in_disc, probs, raw)              # lane-dense store


# ------------------------------ parameter init ------------------------------
def init_params(key, cfg):
    cd, dd, nt = cfg["continuous_dim"], cfg["discrete_dim"], cfg["num_tokens"]
    de, ce, te = cfg["disc_embedding_dim"], cfg["cont_embedding_dim"], cfg["t_emb_dim"]
    hd = cfg["hidden_dim"]
    input_dim = dd * de + ce + te

    shapes = dict(
        emb_table=(nt, de),
        wt1=(te, te), bt1=(te,), wt2=(te, te), bt2=(te,),
        wc1=(cd, ce), bc1=(ce,), wc2=(ce, ce), bc2=(ce,),
        wm1=(input_dim, hd), bm1=(hd,), wm2=(hd, hd), bm2=(hd,),
        wh1=(hd, hd), bh1=(hd,), wh2=(hd, hd), bh2=(hd,),
        wh3=(hd, cd), bh3=(cd,),
        wd1=(hd, hd), bd1=(hd,), wd2=(hd, hd), bd2=(hd,),
        wd3=(hd, dd * nt), bd3=(dd * nt,),
    )
    params = {}
    names = sorted(shapes)
    keys = jax.random.split(key, len(names))
    for k, name in zip(keys, names):
        shp = shapes[name]
        if name.startswith("b"):
            params[name] = 0.05 * jax.random.normal(k, shp, jnp.float32)
        else:
            scale = 1.0 / math.sqrt(max(shp[0], 1))
            params[name] = scale * jax.random.normal(k, shp, jnp.float32)
    return params


# ------------------------ host-side weight/bias packing ---------------------
def pack_params(params, cfg):
    """Pack all linear layers (+ folded embedding + group-sum matrix) into one
    (9,128,128) bf16 weight slab and one (8,128) f32 bias slab."""
    cd, dd, nt = cfg["continuous_dim"], cfg["discrete_dim"], cfg["num_tokens"]
    de, ce, te = cfg["disc_embedding_dim"], cfg["cont_embedding_dim"], cfg["t_emb_dim"]
    hd = cfg["hidden_dim"]
    disc_lo = _layout(cfg)

    W = [jnp.zeros((LANES, LANES), jnp.float32) for _ in range(N_MATS)]
    Bv = jnp.zeros((N_BIAS, LANES), jnp.float32)

    # packed-input lane layout: [x_cont(cd) | t_sin(te) | onehot(dd*nt) | 0]
    c0, t0, d0 = 0, cd, cd + te

    # stage 0: fused first linears of continuous_projection & time_embedding
    W[0] = W[0].at[c0:c0 + cd, 0:ce].set(params["wc1"])
    W[0] = W[0].at[t0:t0 + te, ce:ce + te].set(params["wt1"])
    Bv = Bv.at[0, 0:ce].set(params["bc1"])
    Bv = Bv.at[0, ce:ce + te].set(params["bt1"])

    # stage 1: fused second linears (block-diagonal) -> [c_emb | t_emb]
    W[1] = W[1].at[0:ce, 0:ce].set(params["wc2"])
    W[1] = W[1].at[ce:ce + te, ce:ce + te].set(params["wt2"])
    Bv = Bv.at[1, 0:ce].set(params["bc2"])
    Bv = Bv.at[1, ce:ce + te].set(params["bt2"])

    # trunk layer 1: combined order in wm1 rows is [c_emb | disc_flat | t_emb]
    W[2] = W[2].at[0:ce, 0:hd].set(params["wm1"][0:ce])                 # c_emb
    W[2] = W[2].at[ce:ce + te, 0:hd].set(params["wm1"][ce + dd * de:])  # t_emb
    # embedding fold: onehot(id_g) @ (emb_table @ wm1_group_g) == disc_flat @ wm1_disc
    for g in range(dd):
        m_g = params["emb_table"] @ params["wm1"][ce + g * de: ce + (g + 1) * de]
        W[3] = W[3].at[d0 + g * nt: d0 + (g + 1) * nt, 0:hd].set(m_g)
    Bv = Bv.at[2, 0:hd].set(params["bm1"])

    # trunk layer 2
    W[4] = W[4].at[0:hd, 0:hd].set(params["wm2"])
    Bv = Bv.at[3, 0:hd].set(params["bm2"])

    # fused heads layer 1: [wh1 | wd1]
    W[5] = W[5].at[0:hd, 0:hd].set(params["wh1"])
    W[5] = W[5].at[0:hd, hd:2 * hd].set(params["wd1"])
    Bv = Bv.at[4, 0:hd].set(params["bh1"])
    Bv = Bv.at[4, hd:2 * hd].set(params["bd1"])

    # fused heads layer 2: block-diagonal [wh2, wd2]
    W[6] = W[6].at[0:hd, 0:hd].set(params["wh2"])
    W[6] = W[6].at[hd:2 * hd, hd:2 * hd].set(params["wd2"])
    Bv = Bv.at[5, 0:hd].set(params["bh2"])
    Bv = Bv.at[5, hd:2 * hd].set(params["bd2"])

    # fused output layer: cont drift -> [0,cd), logits -> [disc_lo, disc_lo+dd*nt)
    W[7] = W[7].at[0:hd, 0:cd].set(params["wh3"])
    W[7] = W[7].at[hd:2 * hd, disc_lo:disc_lo + dd * nt].set(params["wd3"])
    Bv = Bv.at[6, 0:cd].set(params["bh3"])
    Bv = Bv.at[6, disc_lo:disc_lo + dd * nt].set(params["bd3"])
    # fold the mask-token "-inf" into the bias (finite, so no inf-inf NaN risk)
    mask_lanes = jnp.array([disc_lo + g * nt + (nt - 1) for g in range(dd)])
    Bv = Bv.at[6, mask_lanes].set(NEG_BIG)

    # stage 8: softmax group-sum matrix (block of ones per nt-lane token group)
    for g in range(dd):
        lo = disc_lo + g * nt
        W[8] = W[8].at[lo:lo + nt, lo:lo + nt].set(1.0)
    # bias row 7: softmax-denominator offset (1.0 off-disc, tiny eps on-disc)
    lane = jnp.arange(LANES)
    is_disc = (lane >= disc_lo) & (lane < disc_lo + dd * nt)
    Bv = Bv.at[7, :].set(jnp.where(is_disc, SUM_EPS, 1.0))

    w_slab = jnp.stack(W, axis=0).astype(WEIGHT_DTYPE)   # (9, 128, 128) bf16
    return dict(w_slab=w_slab, b_slab=Bv)


# --------------------------------- forward ----------------------------------
def _sinusoidal(t, t_emb_dim):
    half = t_emb_dim // 2
    emb_scale = math.log(10000.0) / (half - 1)
    freqs = jnp.exp(jnp.arange(half, dtype=jnp.float32) * -emb_scale)
    args = t.astype(jnp.float32)[:, None] * freqs[None, :]
    return jnp.concatenate([jnp.sin(args), jnp.cos(args)], axis=-1)


def _call_drift(x_in, w_slab, b_slab, *, dd, nt, disc_lo):
    B = x_in.shape[0]
    # Always-gridded path: pad the batch to a tile multiple and iterate.
    tb = BATCH_TILE if B > BATCH_TILE else max(8, ((B + 7) // 8) * 8)
    n_blocks = pl.cdiv(B, tb)
    b_pad = n_blocks * tb
    if b_pad != B:
        x_in = jnp.pad(x_in, ((0, b_pad - B), (0, 0)))

    kernel = functools.partial(drift_kernel, dd=dd, nt=nt, disc_lo=disc_lo)
    out = pl.pallas_call(
        kernel,
        out_shape=jax.ShapeDtypeStruct((b_pad, LANES), jnp.float32),
        grid_spec=pltpu.PrefetchScalarGridSpec(
            num_scalar_prefetch=0,
            grid=(n_blocks,),
            in_specs=[
                pl.BlockSpec((tb, LANES), lambda i: (i, 0)),
                pl.BlockSpec((N_MATS, LANES, LANES), lambda i: (0, 0, 0)),
                pl.BlockSpec((N_BIAS, LANES), lambda i: (0, 0)),
            ],
            out_specs=pl.BlockSpec((tb, LANES), lambda i: (i, 0)),
        ),
        compiler_params=pltpu.CompilerParams(
            dimension_semantics=("parallel",),
            # let XLA fuse the wrapper-side lane packing into the input DMA
            allow_input_fusion=[True, False, False],
        ),
    )(x_in, w_slab, b_slab)
    return out[:B]


def forward(packed, x, t, cfg):
    """x: [B, continuous_dim + discrete_dim]; t: [B, 1] or [B].
    Returns (continuous_drift [B, cd], discrete_probs [B, dd, nt])."""
    cd, dd, nt = cfg["continuous_dim"], cfg["discrete_dim"], cfg["num_tokens"]
    te = cfg["t_emb_dim"]
    disc_lo = _layout(cfg)
    B = x.shape[0]

    if t.ndim == x.ndim:
        t = jnp.squeeze(t, -1)

    x_cont = x[:, :cd].astype(jnp.float32)
    x_disc = x[:, cd:].astype(jnp.int32)

    t_sin = _sinusoidal(t, te)                                        # glue
    onehot = jax.nn.one_hot(x_disc, nt, dtype=jnp.float32).reshape(B, dd * nt)

    # lane-dense packed input: [x_cont | t_sin | onehot | 0] -> one concat,
    # fusable into the kernel's input DMA (no zeros + scatter materialization).
    pad = jnp.zeros((B, LANES - (cd + te + dd * nt)), jnp.float32)
    x_in = jnp.concatenate([x_cont, t_sin, onehot, pad], axis=-1)

    out = _call_drift(x_in, packed["w_slab"], packed["b_slab"],
                      dd=dd, nt=nt, disc_lo=disc_lo)

    cont_drift = out[:, 0:cd]
    probs = out[:, disc_lo:disc_lo + dd * nt].reshape(B, dd, nt)
    # TODO(synk): ret_logits=True branch (returns raw masked logits) not wired up;
    # default ret_logits=False (softmax) path is implemented.
    return cont_drift, probs


# ------------------------- plain-JAX reference (check) -----------------------
def reference_forward(params, x, t, cfg):
    """Mirror of the PyTorch module (bf16-at-the-dot numerics like the kernel)."""
    cd, dd, nt = cfg["continuous_dim"], cfg["discrete_dim"], cfg["num_tokens"]
    de, te = cfg["disc_embedding_dim"], cfg["t_emb_dim"]
    B = x.shape[0]
    if t.ndim == x.ndim:
        t = jnp.squeeze(t, -1)

    def lin(a, w, b):
        return jnp.dot(a.astype(WEIGHT_DTYPE), w.astype(WEIGHT_DTYPE),
                       preferred_element_type=jnp.float32) + b

    x_cont = x[:, :cd].astype(jnp.float32)
    x_disc = x[:, cd:].astype(jnp.int32)

    t_sin = _sinusoidal(t, te)
    t_emb = lin(_silu(lin(t_sin, params["wt1"], params["bt1"])),
                params["wt2"], params["bt2"])
    c_emb = lin(_silu(lin(x_cont, params["wc1"], params["bc1"])),
                params["wc2"], params["bc2"])
    disc_flat = params["emb_table"][x_disc].reshape(B, dd * de)

    combined = jnp.concatenate([c_emb, disc_flat, t_emb], axis=-1)
    h = _silu(lin(combined, params["wm1"], params["bm1"]))
    h = _silu(lin(h, params["wm2"], params["bm2"]))

    hc = _silu(lin(h, params["wh1"], params["bh1"]))
    hc = _silu(lin(hc, params["wh2"], params["bh2"]))
    cont = lin(hc, params["wh3"], params["bh3"])

    hd_ = _silu(lin(h, params["wd1"], params["bd1"]))
    hd_ = _silu(lin(hd_, params["wd2"], params["bd2"]))
    logits = lin(hd_, params["wd3"], params["bd3"]).reshape(B, dd, nt)
    logits = logits.at[..., nt - 1].set(-jnp.inf)
    return cont, jax.nn.softmax(logits, axis=-1)


# ----------------------------------- main ------------------------------------
if __name__ == "__main__":
    key = jax.random.PRNGKey(0)
    k_param, k_cont, k_disc, k_t = jax.random.split(key, 4)

    params = init_params(k_param, CFG)
    packed = pack_params(params, CFG)

    cd, dd, nt = CFG["continuous_dim"], CFG["discrete_dim"], CFG["num_tokens"]
    fwd = jax.jit(functools.partial(forward, cfg=CFG))

    # B=2 exercises the tiny single-step grid, B=1024 the 8-step pipelined grid.
    for B in (2, 1024):
        x_cont = jax.random.normal(jax.random.fold_in(k_cont, B), (B, cd), jnp.float32)
        x_disc = jax.random.randint(jax.random.fold_in(k_disc, B), (B, dd), 0, nt
                                    ).astype(jnp.float32)
        x = jnp.concatenate([x_cont, x_disc], axis=-1)       # [B, cd + dd]
        t = jax.random.uniform(jax.random.fold_in(k_t, B), (B, 1), jnp.float32)

        cont_drift, disc_probs = fwd(packed, x, t)
        jax.block_until_ready((cont_drift, disc_probs))

        assert cont_drift.shape == (B, cd)
        assert disc_probs.shape == (B, dd, nt)
        # mask token gets (numerically) zero probability, rows sum to ~1
        # (MXU group-sum + approx reciprocal relax exactness slightly)
        assert bool(jnp.all(disc_probs[..., nt - 1] <= 1e-6))
        assert bool(jnp.allclose(jnp.sum(disc_probs, axis=-1), 1.0, atol=2e-2))
        assert bool(jnp.all(jnp.isfinite(cont_drift)))
        assert bool(jnp.all(jnp.isfinite(disc_probs)))

        # numerics vs. plain-JAX reference of the original module (bf16 dots)
        ref_cont, ref_probs = reference_forward(params, x, t, CFG)
        assert bool(jnp.allclose(cont_drift, ref_cont, atol=1e-2, rtol=1e-2))
        assert bool(jnp.allclose(disc_probs, ref_probs, atol=2e-2, rtol=2e-2))

    print("KERNEL_OK")
</pallas_src>

<mosaic_0001>
module attributes {stable_mosaic.version = 11 : i64} {
  func.func @drift_kernel(%arg0: i32, %arg1: memref<8x128xf32, #tpu.memory_space<vmem>>, %arg2: memref<9x128x128xbf16, #tpu.memory_space<vmem>>, %arg3: memref<8x128xf32, #tpu.memory_space<vmem>>, %arg4: memref<8x128xf32, #tpu.memory_space<vmem>>) attributes {dimension_semantics = [#tpu.dimension_semantics<parallel>], iteration_bounds = array<i64: 1>, scalar_prefetch = 0 : i64, scratch_operands = 0 : i64, tpu.core_type = #tpu.core_type<tc>, window_params = [{transform_indices = @transform_0, window_bounds = array<i64: 8, 128>}, {pipeline_mode = #tpu.pipeline_mode<synchronous>, transform_indices = @transform_1, window_bounds = array<i64: 9, 128, 128>}, {pipeline_mode = #tpu.pipeline_mode<synchronous>, transform_indices = @transform_2, window_bounds = array<i64: 8, 128>}, {transform_indices = @transform_3, window_bounds = array<i64: 8, 128>}]} {
    %c0 = arith.constant 0 : index
    %c0_0 = arith.constant 0 : index
    %0 = vector.load %arg1[%c0, %c0_0] : memref<8x128xf32, #tpu.memory_space<vmem>>, vector<8x128xf32>
    %c0_1 = arith.constant 0 : index
    %c0_2 = arith.constant 0 : index
    %1 = vector.load %arg3[%c0_1, %c0_2] : memref<8x128xf32, #tpu.memory_space<vmem>>, vector<8x128xf32>
    %2 = arith.truncf %0 : vector<8x128xf32> to vector<8x128xbf16>
    %c0_3 = arith.constant 0 : index
    %c0_4 = arith.constant 0 : index
    %c0_5 = arith.constant 0 : index
    %3 = vector.load %arg2[%c0_3, %c0_4, %c0_5] : memref<9x128x128xbf16, #tpu.memory_space<vmem>>, vector<1x128x128xbf16>
    %4 = vector.shape_cast %3 : vector<1x128x128xbf16> to vector<128x128xbf16>
    %cst = arith.constant dense<0.000000e+00> : vector<8x128xf32>
    %5 = tpu.matmul %2, %4, %cst {dimension_numbers = #tpu.dot_dimension_numbers<[1], [0], [0], [1], [0, 0, 1, 1], [], []>} : vector<8x128xbf16>, vector<128x128xbf16>, vector<8x128xf32> -> vector<8x128xf32>
    %6 = vector.extract_strided_slice %1 {offsets = [0, 0], sizes = [1, 128], strides = [1, 1]} : vector<8x128xf32> to vector<1x128xf32>
    %7 = vector.broadcast %6 : vector<1x128xf32> to vector<8x128xf32>
    %8 = arith.addf %5, %7 : vector<8x128xf32>
    %9 = arith.negf %8 : vector<8x128xf32>
    %10 = math.exp %9 : vector<8x128xf32>
    %cst_6 = arith.constant 1.000000e+00 : f32
    %11 = vector.broadcast %cst_6 : f32 to vector<8x128xf32>
    %12 = arith.addf %11, %10 : vector<8x128xf32>
    %13 = arith.divf %11, %12 : vector<8x128xf32>
    %14 = arith.mulf %8, %13 : vector<8x128xf32>
    %15 = arith.truncf %14 : vector<8x128xf32> to vector<8x128xbf16>
    %c1 = arith.constant 1 : index
    %c0_7 = arith.constant 0 : index
    %c0_8 = arith.constant 0 : index
    %16 = vector.load %arg2[%c1, %c0_7, %c0_8] : memref<9x128x128xbf16, #tpu.memory_space<vmem>>, vector<1x128x128xbf16>
    %17 = vector.shape_cast %16 : vector<1x128x128xbf16> to vector<128x128xbf16>
    %cst_9 = arith.constant dense<0.000000e+00> : vector<8x128xf32>
    %18 = tpu.matmul %15, %17, %cst_9 {dimension_numbers = #tpu.dot_dimension_numbers<[1], [0], [0], [1], [0, 0, 1, 1], [], []>} : vector<8x128xbf16>, vector<128x128xbf16>, vector<8x128xf32> -> vector<8x128xf32>
    %19 = vector.extract_strided_slice %1 {offsets = [1, 0], sizes = [1, 128], strides = [1, 1]} : vector<8x128xf32> to vector<1x128xf32>
    %20 = vector.broadcast %19 : vector<1x128xf32> to vector<8x128xf32>
    %21 = arith.addf %18, %20 : vector<8x128xf32>
    %22 = arith.truncf %21 : vector<8x128xf32> to vector<8x128xbf16>
    %c2 = arith.constant 2 : index
    %c0_10 = arith.constant 0 : index
    %c0_11 = arith.constant 0 : index
    %23 = vector.load %arg2[%c2, %c0_10, %c0_11] : memref<9x128x128xbf16, #tpu.memory_space<vmem>>, vector<1x128x128xbf16>
    %24 = vector.shape_cast %23 : vector<1x128x128xbf16> to vector<128x128xbf16>
    %cst_12 = arith.constant dense<0.000000e+00> : vector<8x128xf32>
    %25 = tpu.matmul %22, %24, %cst_12 {dimension_numbers = #tpu.dot_dimension_numbers<[1], [0], [0], [1], [0, 0, 1, 1], [], []>} : vector<8x128xbf16>, vector<128x128xbf16>, vector<8x128xf32> -> vector<8x128xf32>
    %c3 = arith.constant 3 : index
    %c0_13 = arith.constant 0 : index
    %c0_14 = arith.constant 0 : index
    %26 = vector.load %arg2[%c3, %c0_13, %c0_14] : memref<9x128x128xbf16, #tpu.memory_space<vmem>>, vector<1x128x128xbf16>
    %27 = vector.shape_cast %26 : vector<1x128x128xbf16> to vector<128x128xbf16>
    %cst_15 = arith.constant dense<0.000000e+00> : vector<8x128xf32>
    %28 = tpu.matmul %2, %27, %cst_15 {dimension_numbers = #tpu.dot_dimension_numbers<[1], [0], [0], [1], [0, 0, 1, 1], [], []>} : vector<8x128xbf16>, vector<128x128xbf16>, vector<8x128xf32> -> vector<8x128xf32>
    %29 = arith.addf %25, %28 : vector<8x128xf32>
    %30 = vector.extract_strided_slice %1 {offsets = [2, 0], sizes = [1, 128], strides = [1, 1]} : vector<8x128xf32> to vector<1x128xf32>
    %31 = vector.broadcast %30 : vector<1x128xf32> to vector<8x128xf32>
    %32 = arith.addf %29, %31 : vector<8x128xf32>
    %33 = arith.negf %32 : vector<8x128xf32>
    %34 = math.exp %33 : vector<8x128xf32>
    %cst_16 = arith.constant 1.000000e+00 : f32
    %35 = vector.broadcast %cst_16 : f32 to vector<8x128xf32>
    %36 = arith.addf %35, %34 : vector<8x128xf32>
    %37 = arith.divf %35, %36 : vector<8x128xf32>
    %38 = arith.mulf %32, %37 : vector<8x128xf32>
    %39 = arith.truncf %38 : vector<8x128xf32> to vector<8x128xbf16>
    %c4 = arith.constant 4 : index
    %c0_17 = arith.constant 0 : index
    %c0_18 = arith.constant 0 : index
    %40 = vector.load %arg2[%c4, %c0_17, %c0_18] : memref<9x128x128xbf16, #tpu.memory_space<vmem>>, vector<1x128x128xbf16>
    %41 = vector.shape_cast %40 : vector<1x128x128xbf16> to vector<128x128xbf16>
    %cst_19 = arith.constant dense<0.000000e+00> : vector<8x128xf32>
    %42 = tpu.matmul %39, %41, %cst_19 {dimension_numbers = #tpu.dot_dimension_numbers<[1], [0], [0], [1], [0, 0, 1, 1], [], []>} : vector<8x128xbf16>, vector<128x128xbf16>, vector<8x128xf32> -> vector<8x128xf32>
    %43 = vector.extract_strided_slice %1 {offsets = [3, 0], sizes = [1, 128], strides = [1, 1]} : vector<8x128xf32> to vector<1x128xf32>
    %44 = vector.broadcast %43 : vector<1x128xf32> to vector<8x128xf32>
    %45 = arith.addf %42, %44 : vector<8x128xf32>
    %46 = arith.negf %45 : vector<8x128xf32>
    %47 = math.exp %46 : vector<8x128xf32>
    %cst_20 = arith.constant 1.000000e+00 : f32
    %48 = vector.broadcast %cst_20 : f32 to vector<8x128xf32>
    %49 = arith.addf %48, %47 : vector<8x128xf32>
    %50 = arith.divf %48, %49 : vector<8x128xf32>
    %51 = arith.mulf %45, %50 : vector<8x128xf32>
    %52 = arith.truncf %51 : vector<8x128xf32> to vector<8x128xbf16>
    %c5 = arith.constant 5 : index
    %c0_21 = arith.constant 0 : index
    %c0_22 = arith.constant 0 : index
    %53 = vector.load %arg2[%c5, %c0_21, %c0_22] : memref<9x128x128xbf16, #tpu.memory_space<vmem>>, vector<1x128x128xbf16>
    %54 = vector.shape_cast %53 : vector<1x128x128xbf16> to vector<128x128xbf16>
    %cst_23 = arith.constant dense<0.000000e+00> : vector<8x128xf32>
    %55 = tpu.matmul %52, %54, %cst_23 {dimension_numbers = #tpu.dot_dimension_numbers<[1], [0], [0], [1], [0, 0, 1, 1], [], []>} : vector<8x128xbf16>, vector<128x128xbf16>, vector<8x128xf32> -> vector<8x128xf32>
    %56 = vector.extract_strided_slice %1 {offsets = [4, 0], sizes = [1, 128], strides = [1, 1]} : vector<8x128xf32> to vector<1x128xf32>
    %57 = vector.broadcast %56 : vector<1x128xf32> to vector<8x128xf32>
    %58 = arith.addf %55, %57 : vector<8x128xf32>
    %59 = arith.negf %58 : vector<8x128xf32>
    %60 = math.exp %59 : vector<8x128xf32>
    %cst_24 = arith.constant 1.000000e+00 : f32
    %61 = vector.broadcast %cst_24 : f32 to vector<8x128xf32>
    %62 = arith.addf %61, %60 : vector<8x128xf32>
    %63 = arith.divf %61, %62 : vector<8x128xf32>
    %64 = arith.mulf %58, %63 : vector<8x128xf32>
    %65 = arith.truncf %64 : vector<8x128xf32> to vector<8x128xbf16>
    %c6 = arith.constant 6 : index
    %c0_25 = arith.constant 0 : index
    %c0_26 = arith.constant 0 : index
    %66 = vector.load %arg2[%c6, %c0_25, %c0_26] : memref<9x128x128xbf16, #tpu.memory_space<vmem>>, vector<1x128x128xbf16>
    %67 = vector.shape_cast %66 : vector<1x128x128xbf16> to vector<128x128xbf16>
    %cst_27 = arith.constant dense<0.000000e+00> : vector<8x128xf32>
    %68 = tpu.matmul %65, %67, %cst_27 {dimension_numbers = #tpu.dot_dimension_numbers<[1], [0], [0], [1], [0, 0, 1, 1], [], []>} : vector<8x128xbf16>, vector<128x128xbf16>, vector<8x128xf32> -> vector<8x128xf32>
    %69 = vector.extract_strided_slice %1 {offsets = [5, 0], sizes = [1, 128], strides = [1, 1]} : vector<8x128xf32> to vector<1x128xf32>
    %70 = vector.broadcast %69 : vector<1x128xf32> to vector<8x128xf32>
    %71 = arith.addf %68, %70 : vector<8x128xf32>
    %72 = arith.negf %71 : vector<8x128xf32>
    %73 = math.exp %72 : vector<8x128xf32>
    %cst_28 = arith.constant 1.000000e+00 : f32
    %74 = vector.broadcast %cst_28 : f32 to vector<8x128xf32>
    %75 = arith.addf %74, %73 : vector<8x128xf32>
    %76 = arith.divf %74, %75 : vector<8x128xf32>
    %77 = arith.mulf %71, %76 : vector<8x128xf32>
    %78 = arith.truncf %77 : vector<8x128xf32> to vector<8x128xbf16>
    %c7 = arith.constant 7 : index
    %c0_29 = arith.constant 0 : index
    %c0_30 = arith.constant 0 : index
    %79 = vector.load %arg2[%c7, %c0_29, %c0_30] : memref<9x128x128xbf16, #tpu.memory_space<vmem>>, vector<1x128x128xbf16>
    %80 = vector.shape_cast %79 : vector<1x128x128xbf16> to vector<128x128xbf16>
    %cst_31 = arith.constant dense<0.000000e+00> : vector<8x128xf32>
    %81 = tpu.matmul %78, %80, %cst_31 {dimension_numbers = #tpu.dot_dimension_numbers<[1], [0], [0], [1], [0, 0, 1, 1], [], []>} : vector<8x128xbf16>, vector<128x128xbf16>, vector<8x128xf32> -> vector<8x128xf32>
    %82 = vector.extract_strided_slice %1 {offsets = [6, 0], sizes = [1, 128], strides = [1, 1]} : vector<8x128xf32> to vector<1x128xf32>
    %83 = vector.broadcast %82 : vector<1x128xf32> to vector<8x128xf32>
    %84 = arith.addf %81, %83 : vector<8x128xf32>
    %85 = tpu.iota {dimensions = array<i32: 1>} : vector<1x128xi32>
    %c8_i32 = arith.constant 8 : i32
    %86 = vector.broadcast %c8_i32 : i32 to vector<1x128xi32>
    %87 = arith.cmpi sge, %85, %86 : vector<1x128xi32>
    %c40_i32 = arith.constant 40 : i32
    %88 = vector.broadcast %c40_i32 : i32 to vector<1x128xi32>
    %89 = arith.cmpi slt, %85, %88 : vector<1x128xi32>
    %90 = arith.andi %87, %89 : vector<1x128xi1>
    %cst_32 = arith.constant -1.000000e+30 : f32
    %91 = vector.shape_cast %90 : vector<1x128xi1> to vector<1x128xi1>
    %92 = vector.broadcast %91 : vector<1x128xi1> to vector<8x128xi1>
    %93 = vector.broadcast %cst_32 : f32 to vector<8x128xf32>
    %94 = arith.select %92, %84, %93 : vector<8x128xi1>, vector<8x128xf32>
    %cst_33 = arith.constant dense<0xFF800000> : vector<8xf32>
    %95 = vector.multi_reduction <maximumf>, %94, %cst_33 [1] : vector<8x128xf32> to vector<8xf32>
    %96 = vector.shape_cast %95 : vector<8xf32> to vector<8x1xf32>
    %97 = vector.broadcast %96 : vector<8x1xf32> to vector<8x128xf32>
    %98 = arith.subf %84, %97 : vector<8x128xf32>
    %cst_34 = arith.constant -1.000000e+30 : f32
    %99 = vector.shape_cast %90 : vector<1x128xi1> to vector<1x128xi1>
    %100 = vector.broadcast %99 : vector<1x128xi1> to vector<8x128xi1>
    %101 = vector.broadcast %cst_34 : f32 to vector<8x128xf32>
    %102 = arith.select %100, %98, %101 : vector<8x128xi1>, vector<8x128xf32>
    %103 = math.exp %102 : vector<8x128xf32>
    %104 = arith.truncf %103 : vector<8x128xf32> to vector<8x128xbf16>
    %c8 = arith.constant 8 : index
    %c0_35 = arith.constant 0 : index
    %c0_36 = arith.constant 0 : index
    %105 = vector.load %arg2[%c8, %c0_35, %c0_36] : memref<9x128x128xbf16, #tpu.memory_space<vmem>>, vector<1x128x128xbf16>
    %106 = vector.shape_cast %105 : vector<1x128x128xbf16> to vector<128x128xbf16>
    %cst_37 = arith.constant dense<0.000000e+00> : vector<8x128xf32>
    %107 = tpu.matmul %104, %106, %cst_37 {dimension_numbers = #tpu.dot_dimension_numbers<[1], [0], [0], [1], [0, 0, 1, 1], [], []>} : vector<8x128xbf16>, vector<128x128xbf16>, vector<8x128xf32> -> vector<8x128xf32>
    %108 = vector.extract_strided_slice %1 {offsets = [7, 0], sizes = [1, 128], strides = [1, 1]} : vector<8x128xf32> to vector<1x128xf32>
    %109 = vector.broadcast %108 : vector<1x128xf32> to vector<8x128xf32>
    %110 = arith.addf %107, %109 : vector<8x128xf32>
    %111 = tpu.reciprocal %110 {approx = true} : vector<8x128xf32> -> vector<8x128xf32>
    %112 = arith.mulf %103, %111 : vector<8x128xf32>
    %113 = vector.shape_cast %90 : vector<1x128xi1> to vector<1x128xi1>
    %114 = vector.broadcast %113 : vector<1x128xi1> to vector<8x128xi1>
    %115 = arith.select %114, %112, %84 : vector<8x128xi1>, vector<8x128xf32>
    %c0_38 = arith.constant 0 : index
    %c0_39 = arith.constant 0 : index
    %116 = vector.load %arg4[%c0_38, %c0_39] : memref<8x128xf32, #tpu.memory_space<vmem>>, vector<8x128xf32>
    tpu.vector_store %arg4[%c0_38, %c0_39], %115 {strides = array<i32>} : memref<8x128xf32, #tpu.memory_space<vmem>>, vector<8x128xf32>,
    return
  }
  func.func @transform_0(%arg0: i32) -> (i32, i32) {
    %c0_i32 = arith.constant 0 : i32
    %c0_i32_0 = arith.constant 0 : i32
    return %arg0, %c0_i32 : i32, i32
  }
  func.func @transform_1(%arg0: i32) -> (i32, i32, i32) {
    %c0_i32 = arith.constant 0 : i32
    %c0_i32_0 = arith.constant 0 : i32
    %c0_i32_1 = arith.constant 0 : i32
    %c0_i32_2 = arith.constant 0 : i32
    return %c0_i32, %c0_i32_0, %c0_i32_1 : i32, i32, i32
  }
  func.func @transform_2(%arg0: i32) -> (i32, i32) {
    %c0_i32 = arith.constant 0 : i32
    %c0_i32_0 = arith.constant 0 : i32
    %c0_i32_1 = arith.constant 0 : i32
    return %c0_i32, %c0_i32_0 : i32, i32
  }
  func.func @transform_3(%arg0: i32) -> (i32, i32) {
    %c0_i32 = arith.constant 0 : i32
    %c0_i32_0 = arith.constant 0 : i32
    return %arg0, %c0_i32 : i32, i32
  }
}

</mosaic_0001>

<bundles_post_ra>
// kernel: forward.2
= control target key start
LH: loop header
LB: loop body
LE: loop exit
PB: predicated region body
PF: predicated region fallthrough
CT: control target
= control target key end

     0   :  { %s1724_s0 = inlined_call_operand.hbm [shape: bf16[9,128,128], index: 0, kind: input, shape index: {}]   ;;  %s1725_s1 = inlined_call_operand.vmem [shape: f32[8,128], index: 1, kind: input, shape index: {}]   ;;  %s1726_s2 = inlined_call_operand.vmem [shape: f32[2,128], index: 2, kind: input, shape index: {}]   ;;  %s1727_s3 = inlined_call_operand.<no memory space> [shape: f32[], index: 3, kind: input, shape index: {}]   ;;  %s1728_s4 = inlined_call_operand.vmem [shape: f32[8,128], index: 4, kind: output, shape index: {}]  }
   0x1   :  { %v9_v0 = vstv %s1727_s3 }
   0x2   :  { %10 = vsyncpa [#allocation8], 0  ;;  %s1547_s17 = smov [#allocation7]   ;;  %s1523_s21 = scalar_lea.hbm %s1724_s0, 9216 }
   0x3   :  { %s18_s18 = sshll.u32 %s1547_s17, 4  ;;  %p1524_p0 = scmp.ne.s32.totalorder %s1724_s0, %s1523_s21  ;;  %s19_s18 = int_to_ptr.vmem [resolvable:$true] %s18_s18 }
   0x4   :  { %p1527_p1 = scmp.lt.u32.totalorder %s1523_s21, %s1724_s0 }
   0x6   :  { %p1529_p2 = pnand %p1527_p1, %p1524_p0 }
   0x8   :  { %1532 = shalt.err (!%p1529_p2)
}
   0x9   :  { %s1533_s26 = scalar_lea.vmem %s19_s18, 9216  ;;  %p1538_p4 = scmp.lt.s32.totalorder %s19_s18, %s19_s18 }
   0xa   :  { %p1534_p3 = scmp.ne.s32.totalorder %s19_s18, %s1533_s26  ;;  %p1539_p5 = scmp.lt.s32.totalorder %s1533_s26, %s1533_s26 }
   0xc   :  { %p1540_p6 = por %p1539_p5, %p1538_p4 }
   0xe   :  { %p1541_p7 = pnand %p1540_p6, %p1534_p3 }
  0x10   :  { %1544 = shalt.err (!%p1541_p7)
}
  0x11   :  { %s1548_s3 = smov 64   ;;  %s1549_s27 = smov 4  }
  0x12   :  { %24 = dma.hbm_to_vmem [thread:$0]  %s1724_s0, 9216, %s19_s18, [#allocation8], %s1548_s3, %s1548_s3, %s1549_s27  }
  0x13   :  { %1545 = dma.done.wait [#allocation8], 9216  }
  0x14   :  { %1546 = vsyncadd [#allocation8], 4294958080  ;;  %v1550_v1 = vmov 0.0   ;;  %vm1551_vm0 = vmmov 0   ;;  %v1427_v2 = vld [vmem:[#allocation7] sm:$0xff]   ;;  %v1428_v3 = vld [vmem:[#allocation7 + $0x8] sm:$0xff]   ;;  %v31_v4 = vlaneseq }
  0x15   :  { %1242 = vmatprep.subr.bf16.mxu0 %v1550_v1  ;;  %1258 = vmatprep.mubr.msk.bf16.mxu0 %vm1551_vm0, %v1550_v1  ;;  %v1429_v5 = vld [vmem:[#allocation7 + $0x10] sm:$0xff]   ;;  %v1430_v6 = vld [vmem:[#allocation7 + $0x18] sm:$0xff]   ;;  %v1431_v8 = vld [vmem:[#allocation7 + $0x20] sm:$0xff]  }
  0x16   :  { %1262 = vmatprep.subr.bf16.mxu1 %v1550_v1  ;;  %1278 = vmatprep.mubr.msk.bf16.mxu1 %vm1551_vm0, %v1550_v1  ;;  %v1601_v7 = vshrl.u32 %v31_v4, 7  ;;  %v1432_v9 = vld [vmem:[#allocation7 + $0x28] sm:$0xff]   ;;  %v1433_v10 = vld [vmem:[#allocation7 + $0x30] sm:$0xff]   ;;  %v30_v11 = vld [vmem:[%s1726_s2] sm:$0x3] }
  0x17   :  { %1243 = vmatpush3.bf16.msra.mxu0 %v1427_v2  ;;  %v1434_v12 = vld [vmem:[#allocation7 + $0x38] sm:$0xff]   ;;  %v1435_v15 = vld [vmem:[#allocation7 + $0x40] sm:$0xff]   ;;  %v1436_v16 = vld [vmem:[#allocation7 + $0x48] sm:$0xff]  }
  0x18   :  { %1244 = vmatprep.subr.bf16.mxu0 %v1550_v1  ;;  %vm34_vm1 = vcmp.lt.s32.totalorder %v1601_v7, 2  ;;  %1263 = vmatpush3.bf16.msra.mxu1 %v1435_v15  ;;  %v1437_v17 = vld [vmem:[#allocation7 + $0x50] sm:$0xff]   ;;  %v1438_v18 = vld [vmem:[#allocation7 + $0x58] sm:$0xff]   ;;  %v1439_v19 = vld [vmem:[#allocation7 + $0x60] sm:$0xff]   ;;  %v60_v31 = vsub.s32 0, %v1601_v7  ;;  %v177_v57 = vsub.s32 1, %v1601_v7 }
  0x19   :  { %v35_v13 = vsel %vm34_vm1, %v30_v11, %v9_v0  ;;  %1264 = vmatprep.subr.bf16.mxu1 %v1550_v1  ;;  %v1440_v20 = vld [vmem:[#allocation7 + $0x68] sm:$0xff]   ;;  %v1441_v21 = vld [vmem:[#allocation7 + $0x70] sm:$0xff]   ;;  %v1442_v22 = vld [vmem:[#allocation7 + $0x78] sm:$0xff]  }
  0x1a   :  { %v41_v14 = vpack.c.bf16 %v35_v13, %v35_v13  ;;  %v1443_v23 = vld [vmem:[#allocation7 + $0xc0] sm:$0xff]   ;;  %v1445_v24 = vld [vmem:[#allocation7 + $0xc8] sm:$0xff]   ;;  %v1447_v25 = vld [vmem:[#allocation7 + $0xd0] sm:$0xff]  }
  0x1b   :  { %1245 = vmatpush3.bf16.msra.mxu0 %v1428_v3  ;;  %v1449_v26 = vld [vmem:[#allocation7 + $0xd8] sm:$0xff]   ;;  %v1451_v27 = vld [vmem:[#allocation7 + $0xe0] sm:$0xff]   ;;  %v1453_v28 = vld [vmem:[#allocation7 + $0xe8] sm:$0xff]  }
  0x1c   :  { %1246 = vmatprep.subr.bf16.mxu0 %v1550_v1  ;;  %1265 = vmatpush3.bf16.msra.mxu1 %v1436_v16  ;;  %v1455_v29 = vld [vmem:[#allocation7 + $0xf0] sm:$0xff]   ;;  %v1457_v30 = vld [vmem:[#allocation7 + $0xf8] sm:$0xff]   ;;  %v1637_v32 = vld [vmem:[%s1725_s1] sm:$0xff] }
  0x1d   :  { %1266 = vmatprep.subr.bf16.mxu1 %v1550_v1  ;;  %v61_v33 = vrot.slane %v1637_v32, %v60_v31  ;;  %v1444_v44 = vld [vmem:[#allocation7 + $0x80] sm:$0xff]   ;;  %v1446_v46 = vld [vmem:[#allocation7 + $0x88] sm:$0xff]   ;;  %v1448_v47 = vld [vmem:[#allocation7 + $0x90] sm:$0xff]   ;;  %v178_v58 = vrot.slane %v1637_v32, %v177_v57 }
  0x1e   :  { %v1450_v48 = vld [vmem:[#allocation7 + $0x98] sm:$0xff]   ;;  %v1452_v49 = vld [vmem:[#allocation7 + $0xa0] sm:$0xff]   ;;  %v1454_v50 = vld [vmem:[#allocation7 + $0xa8] sm:$0xff]  }
  0x1f   :  { %1247 = vmatpush3.bf16.msra.mxu0 %v1429_v5  ;;  %v1456_v51 = vld [vmem:[#allocation7 + $0xb0] sm:$0xff]   ;;  %v1458_v52 = vld [vmem:[#allocation7 + $0xb8] sm:$0xff]   ;;  %v1459_v2 = vld [vmem:[#allocation7 + $0x100] sm:$0xff]  }
  0x20   :  { %1248 = vmatprep.subr.bf16.mxu0 %v1550_v1  ;;  %1267 = vmatpush3.bf16.msra.mxu1 %v1437_v17  ;;  %v1460_v3 = vld [vmem:[#allocation7 + $0x108] sm:$0xff]   ;;  %v1461_v5 = vld [vmem:[#allocation7 + $0x110] sm:$0xff]   ;;  %v1466_v11 = vld [vmem:[#allocation7 + $0x138] sm:$0xff]  }
  0x21   :  { %1268 = vmatprep.subr.bf16.mxu1 %v1550_v1  ;;  %v1472_v31 = vld [vmem:[#allocation7 + $0x168] sm:$0xff]  }
  0x23   :  { %1249 = vmatpush3.bf16.msra.mxu0 %v1430_v6  ;;  %v1462_v6 = vld [vmem:[#allocation7 + $0x118] sm:$0xff]  }
  0x24   :  { %1250 = vmatprep.subr.bf16.mxu0 %v1550_v1  ;;  %1269 = vmatpush3.bf16.msra.mxu1 %v1438_v18 }
  0x25   :  { %1270 = vmatprep.subr.bf16.mxu1 %v1550_v1 }
  0x27   :  { %1251 = vmatpush3.bf16.msra.mxu0 %v1431_v8  ;;  %v1463_v8 = vld [vmem:[#allocation7 + $0x120] sm:$0xff]  }
  0x28   :  { %1252 = vmatprep.subr.bf16.mxu0 %v1550_v1  ;;  %1271 = vmatpush3.bf16.msra.mxu1 %v1439_v19 }
  0x29   :  { %1272 = vmatprep.subr.bf16.mxu1 %v1550_v1 }
  0x2b   :  { %1253 = vmatpush3.bf16.msra.mxu0 %v1432_v9  ;;  %v1464_v9 = vld [vmem:[#allocation7 + $0x128] sm:$0xff]  }
  0x2c   :  { %1254 = vmatprep.subr.bf16.mxu0 %v1550_v1  ;;  %1273 = vmatpush3.bf16.msra.mxu1 %v1440_v20 }
  0x2d   :  { %1274 = vmatprep.subr.bf16.mxu1 %v1550_v1 }
  0x2f   :  { %1255 = vmatpush3.bf16.msra.mxu0 %v1433_v10  ;;  %v1465_v10 = vld [vmem:[#allocation7 + $0x130] sm:$0xff]  }
  0x30   :  { %1256 = vmatprep.subr.bf16.mxu0 %v1550_v1  ;;  %1275 = vmatpush3.bf16.msra.mxu1 %v1441_v21 }
  0x31   :  { %1276 = vmatprep.subr.bf16.mxu1 %v1550_v1 }
  0x33   :  { %1257 = vmatpush3.bf16.msra.mxu0 %v1434_v12  ;;  %v480_v12 = vsub.s32 2, %v1601_v7 }
  0x34   :  { %1282 = vmatprep.subr.bf16.mxu0 %v1550_v1  ;;  %1277 = vmatpush3.bf16.msra.mxu1 %v1442_v22 }
  0x35   :  { %1302 = vmatprep.subr.bf16.mxu1 %v1550_v1  ;;  %v481_v13 = vrot.slane %v1637_v32, %v480_v12  ;;  %v1487_v12 = vld [vmem:[#allocation7 + $0x1e0] sm:$0xff]  }
  0x36   :  { %1259 = vmatmul.mubr.bf16.vlgmr.msra.gmra.mrb[0].mxu0 %v41_v14 }
  0x37   :  { %1298 = vmatprep.mubr.msk.bf16.mxu0 %vm1551_vm0, %v1550_v1  ;;  %1283 = vmatpush3.bf16.msra.mxu0 %v1443_v23 }
  0x38   :  { %1284 = vmatprep.subr.bf16.mxu0 %v1550_v1 }
  0x3b   :  { %1285 = vmatpush3.bf16.msra.mxu0 %v1445_v24 }
  0x3c   :  { %1286 = vmatprep.subr.bf16.mxu0 %v1550_v1 }
  0x3f   :  { %1287 = vmatpush3.bf16.msra.mxu0 %v1447_v25 }
  0x40   :  { %1288 = vmatprep.subr.bf16.mxu0 %v1550_v1 }
  0x43   :  { %1289 = vmatpush3.bf16.msra.mxu0 %v1449_v26  ;;  %v1467_v26 = vld [vmem:[#allocation7 + $0x140] sm:$0xff]  }
  0x44   :  { %1290 = vmatprep.subr.bf16.mxu0 %v1550_v1 }
  0x47   :  { %1291 = vmatpush3.bf16.msra.mxu0 %v1451_v27  ;;  %v1468_v27 = vld [vmem:[#allocation7 + $0x148] sm:$0xff]  }
  0x48   :  { %1292 = vmatprep.subr.bf16.mxu0 %v1550_v1 }
  0x4b   :  { %1293 = vmatpush3.bf16.msra.mxu0 %v1453_v28  ;;  %v1469_v28 = vld [vmem:[#allocation7 + $0x150] sm:$0xff]  }
  0x4c   :  { %1294 = vmatprep.subr.bf16.mxu0 %v1550_v1 }
  0x4f   :  { %1295 = vmatpush3.bf16.msra.mxu0 %v1455_v29  ;;  %v1470_v29 = vld [vmem:[#allocation7 + $0x158] sm:$0xff]  }
  0x50   :  { %1296 = vmatprep.subr.bf16.mxu0 %v1550_v1 }
  0x53   :  { %1297 = vmatpush3.bf16.msra.mxu0 %v1457_v30  ;;  %v1471_v30 = vld [vmem:[#allocation7 + $0x160] sm:$0xff]  }
  0x54   :  { %1322 = vmatprep.subr.bf16.mxu0 %v1550_v1 }
  0x56   :  { %1299 = vmatmul.mubr.bf16.vlgmr.msra.gmra.mrb[4].mxu0 %v41_v14 }
  0x57   :  { %1338 = vmatprep.mubr.msk.bf16.mxu0 %vm1551_vm0, %v1550_v1  ;;  %1323 = vmatpush3.bf16.msra.mxu0 %v1459_v2 }
  0x58   :  { %1324 = vmatprep.subr.bf16.mxu0 %v1550_v1 }
  0x5b   :  { %1325 = vmatpush3.bf16.msra.mxu0 %v1460_v3 }
  0x5c   :  { %1326 = vmatprep.subr.bf16.mxu0 %v1550_v1 }
  0x5f   :  { %1327 = vmatpush3.bf16.msra.mxu0 %v1461_v5 }
  0x60   :  { %1328 = vmatprep.subr.bf16.mxu0 %v1550_v1 }
  0x63   :  { %1329 = vmatpush3.bf16.msra.mxu0 %v1462_v6 }
  0x64   :  { %1330 = vmatprep.subr.bf16.mxu0 %v1550_v1 }
  0x67   :  { %1331 = vmatpush3.bf16.msra.mxu0 %v1463_v8  ;;  %v1483_v8 = vld [vmem:[#allocation7 + $0x1c0] sm:$0xff]  }
  0x68   :  { %1332 = vmatprep.subr.bf16.mxu0 %v1550_v1 }
  0x6b   :  { %1333 = vmatpush3.bf16.msra.mxu0 %v1464_v9  ;;  %v1484_v9 = vld [vmem:[#allocation7 + $0x1c8] sm:$0xff]  }
  0x6c   :  { %1334 = vmatprep.subr.bf16.mxu0 %v1550_v1 }
  0x6f   :  { %1335 = vmatpush3.bf16.msra.mxu0 %v1465_v10  ;;  %v1485_v10 = vld [vmem:[#allocation7 + $0x1d0] sm:$0xff]  }
  0x70   :  { %1336 = vmatprep.subr.bf16.mxu0 %v1550_v1 }
  0x73   :  { %1337 = vmatpush3.bf16.msra.mxu0 %v1466_v11  ;;  %v1486_v11 = vld [vmem:[#allocation7 + $0x1d8] sm:$0xff]  }
  0x74   :  { %1362 = vmatprep.subr.bf16.mxu0 %v1550_v1 }
 0x109   :  { %v144_v34 = vpop.f32.mrb[0].mxu0 }
 0x10a   :  { %v145_v35 = vadd.f32 %v144_v34, %v61_v33  ;;  %v1260_v36 = vpop.f32.mrb[1].mxu0  ;;  %v1473_v33 = vld [vmem:[#allocation7 + $0x170] sm:$0xff]   ;;  %v1474_v34 = vld [vmem:[#allocation7 + $0x178] sm:$0xff]  }
 0x10b   :  { %v147_v37 = vpop.f32.mrb[2].mxu0 }
 0x10c   :  { %v1092_v38 = vmul.f32 -1.442695, %v145_v35  ;;  %v1261_v39 = vpop.f32.mrb[3].mxu0 }
 0x10e   :  { %1499 = vpow2.f32 %v1092_v38 }
 0x118   :  { %v1500_v40 = vpop.eup %1499 }
 0x119   :  { %v153_v41 = vadd.f32 1.0, %v1500_v40 }
 0x11b   :  { %1501 = vrcp.f32 %v153_v41 }
 0x125   :  { %v1502_v42 = vpop.eup %1501 }
 0x126   :  { %v156_v43 = vmul.f32 %v1502_v42, %v145_v35  ;;  %v510_v35 = vsub.s32 3, %v1601_v7 }
 0x128   :  { %v157_v45 = vpack.c.bf16 %v156_v43, %v156_v43  ;;  %v511_v36 = vrot.slane %v1637_v32, %v510_v35 }
 0x129   :  { %v384_v53 = vpop.f32.mrb[4].mxu0 }
 0x12a   :  { %1279 = vmatmul.mubr.bf16.vlgmr.msra.gmra.mrb[0].mxu1 %v157_v45  ;;  %v1300_v54 = vpop.f32.mrb[5].mxu0 }
 0x12b   :  { %1303 = vmatpush3.bf16.msra.mxu1 %v1444_v44  ;;  %1318 = vmatprep.mubr.msk.bf16.mxu1 %vm1551_vm0, %v1550_v1  ;;  %v387_v55 = vpop.f32.mrb[6].mxu0  ;;  %v1481_v54 = vld [vmem:[#allocation7 + $0x1b0] sm:$0xff]  }
 0x12c   :  { %1304 = vmatprep.subr.bf16.mxu1 %v1550_v1  ;;  %v1301_v56 = vpop.f32.mrb[7].mxu0  ;;  %v1482_v55 = vld [vmem:[#allocation7 + $0x1b8] sm:$0xff]  }
 0x12d   :  { %v627_v56 = vsub.s32 4, %v1601_v7 }
 0x12f   :  { %1305 = vmatpush3.bf16.msra.mxu1 %v1446_v46  ;;  %v628_v57 = vrot.slane %v1637_v32, %v627_v56 }
 0x130   :  { %1306 = vmatprep.subr.bf16.mxu1 %v1550_v1 }
 0x133   :  { %1307 = vmatpush3.bf16.msra.mxu1 %v1448_v47 }
 0x134   :  { %1308 = vmatprep.subr.bf16.mxu1 %v1550_v1 }
 0x137   :  { %1309 = vmatpush3.bf16.msra.mxu1 %v1450_v48  ;;  %v1475_v48 = vld [vmem:[#allocation7 + $0x180] sm:$0xff]  }
 0x138   :  { %1310 = vmatprep.subr.bf16.mxu1 %v1550_v1 }
 0x13b   :  { %1311 = vmatpush3.bf16.msra.mxu1 %v1452_v49  ;;  %v1476_v49 = vld [vmem:[#allocation7 + $0x188] sm:$0xff]  }
 0x13c   :  { %1312 = vmatprep.subr.bf16.mxu1 %v1550_v1 }
 0x13f   :  { %1313 = vmatpush3.bf16.msra.mxu1 %v1454_v50  ;;  %v1477_v50 = vld [vmem:[#allocation7 + $0x190] sm:$0xff]  }
 0x140   :  { %1314 = vmatprep.subr.bf16.mxu1 %v1550_v1 }
 0x143   :  { %1315 = vmatpush3.bf16.msra.mxu1 %v1456_v51  ;;  %v1478_v51 = vld [vmem:[#allocation7 + $0x198] sm:$0xff]  }
 0x144   :  { %1316 = vmatprep.subr.bf16.mxu1 %v1550_v1 }
 0x147   :  { %1317 = vmatpush3.bf16.msra.mxu1 %v1458_v52  ;;  %v1479_v52 = vld [vmem:[#allocation7 + $0x1a0] sm:$0xff]  }
 0x148   :  { %1342 = vmatprep.subr.bf16.mxu1 %v1550_v1 }
 0x1fd   :  { %v261_v59 = vpop.f32.mrb[0].mxu1 }
 0x1fe   :  { %v262_v60 = vadd.f32 %v261_v59, %v178_v58  ;;  %v1280_v61 = vpop.f32.mrb[1].mxu1 }
 0x1ff   :  { %v264_v62 = vpop.f32.mrb[2].mxu1 }
 0x200   :  { %v267_v63 = vpack.c.bf16 %v262_v60, %v262_v60  ;;  %v1281_v0 = vpop.f32.mrb[3].mxu1 }
 0x202   :  { %1319 = vmatmul.mubr.bf16.vlgmr.msra.gmra.mrb[4].mxu1 %v267_v63 }
 0x203   :  { %1358 = vmatprep.mubr.msk.bf16.mxu1 %vm1551_vm0, %v1550_v1  ;;  %1343 = vmatpush3.bf16.msra.mxu1 %v1467_v26 }
 0x204   :  { %1344 = vmatprep.subr.bf16.mxu1 %v1550_v1 }
 0x207   :  { %1345 = vmatpush3.bf16.msra.mxu1 %v1468_v27 }
 0x208   :  { %1346 = vmatprep.subr.bf16.mxu1 %v1550_v1 }
 0x20b   :  { %1347 = vmatpush3.bf16.msra.mxu1 %v1469_v28 }
 0x20c   :  { %1348 = vmatprep.subr.bf16.mxu1 %v1550_v1 }
 0x20f   :  { %1349 = vmatpush3.bf16.msra.mxu1 %v1470_v29  ;;  %v1491_v29 = vld [vmem:[#allocation7 + $0x200] sm:$0xff]  }
 0x210   :  { %1350 = vmatprep.subr.bf16.mxu1 %v1550_v1 }
 0x213   :  { %1351 = vmatpush3.bf16.msra.mxu1 %v1471_v30  ;;  %v1492_v30 = vld [vmem:[#allocation7 + $0x208] sm:$0xff]  }
 0x214   :  { %1352 = vmatprep.subr.bf16.mxu1 %v1550_v1 }
 0x217   :  { %1353 = vmatpush3.bf16.msra.mxu1 %v1472_v31  ;;  %v1493_v31 = vld [vmem:[#allocation7 + $0x210] sm:$0xff]  }
 0x218   :  { %1354 = vmatprep.subr.bf16.mxu1 %v1550_v1 }
 0x21b   :  { %1355 = vmatpush3.bf16.msra.mxu1 %v1473_v33  ;;  %v861_v33 = vsub.s32 6, %v1601_v7 }
 0x21c   :  { %1356 = vmatprep.subr.bf16.mxu1 %v1550_v1 }
 0x21d   :  { %v862_v35 = vrot.slane %v1637_v32, %v861_v33 }
 0x21f   :  { %1357 = vmatpush3.bf16.msra.mxu1 %v1474_v34  ;;  %v952_v34 = vand.u32 127, %v31_v4  ;;  %v1495_v4 = vld [vmem:[#allocation7 + $0x220] sm:$0xff]  }
 0x220   :  { %1382 = vmatprep.subr.bf16.mxu1 %v1550_v1 }
 0x221   :  { %vm953_vm2 = vcmp.ge.s32.totalorder %v952_v34, 8  ;;  %vm954_vm3 = vcmp.lt.s32.totalorder %v952_v34, 40 }
 0x222   :  { %vm1705_vm4 = vmand %vm953_vm2, %vm954_vm3 }
 0x2d5   :  { %v472_v14 = vpop.f32.mrb[4].mxu1 }
 0x2d6   :  { %v473_v15 = vadd.f32 %v472_v14, %v384_v53  ;;  %v1320_v16 = vpop.f32.mrb[5].mxu1  ;;  %v1480_v53 = vld [vmem:[#allocation7 + $0x1a8] sm:$0xff]   ;;  %v1489_v14 = vld [vmem:[#allocation7 + $0x1f0] sm:$0xff]  }
 0x2d7   :  { %v475_v17 = vpop.f32.mrb[6].mxu1  ;;  %v744_v16 = vsub.s32 5, %v1601_v7 }
 0x2d8   :  { %v482_v18 = vadd.f32 %v481_v13, %v473_v15  ;;  %v1321_v19 = vpop.f32.mrb[7].mxu1  ;;  %v1488_v13 = vld [vmem:[#allocation7 + $0x1e8] sm:$0xff]   ;;  %v1490_v15 = vld [vmem:[#allocation7 + $0x1f8] sm:$0xff]  }
 0x2d9   :  { %v745_v17 = vrot.slane %v1637_v32, %v744_v16 }
 0x2da   :  { %v1117_v20 = vmul.f32 -1.442695, %v482_v18 }
 0x2dc   :  { %1503 = vpow2.f32 %v1117_v20 }
 0x2e6   :  { %v1504_v21 = vpop.eup %1503 }
 0x2e7   :  { %v486_v22 = vadd.f32 1.0, %v1504_v21 }
 0x2e9   :  { %1505 = vrcp.f32 %v486_v22 }
 0x2f3   :  { %v1506_v23 = vpop.eup %1505 }
 0x2f4   :  { %v489_v24 = vmul.f32 %v1506_v23, %v482_v18 }
 0x2f6   :  { %v490_v25 = vpack.c.bf16 %v489_v24, %v489_v24 }
 0x2f8   :  { %1339 = vmatmul.mubr.bf16.vlgmr.msra.gmra.mrb[8].mxu0 %v490_v25 }
 0x2f9   :  { %1378 = vmatprep.mubr.msk.bf16.mxu0 %vm1551_vm0, %v1550_v1  ;;  %1363 = vmatpush3.bf16.msra.mxu0 %v1475_v48 }
 0x2fa   :  { %1364 = vmatprep.subr.bf16.mxu0 %v1550_v1 }
 0x2fd   :  { %1365 = vmatpush3.bf16.msra.mxu0 %v1476_v49 }
 0x2fe   :  { %1366 = vmatprep.subr.bf16.mxu0 %v1550_v1 }
 0x301   :  { %1367 = vmatpush3.bf16.msra.mxu0 %v1477_v50 }
 0x302   :  { %1368 = vmatprep.subr.bf16.mxu0 %v1550_v1 }
 0x305   :  { %1369 = vmatpush3.bf16.msra.mxu0 %v1478_v51 }
 0x306   :  { %1370 = vmatprep.subr.bf16.mxu0 %v1550_v1 }
 0x309   :  { %1371 = vmatpush3.bf16.msra.mxu0 %v1479_v52 }
 0x30a   :  { %1372 = vmatprep.subr.bf16.mxu0 %v1550_v1 }
 0x30d   :  { %1373 = vmatpush3.bf16.msra.mxu0 %v1480_v53  ;;  %v985_v53 = vsub.s32 7, %v1601_v7 }
 0x30e   :  { %1374 = vmatprep.subr.bf16.mxu0 %v1550_v1 }
 0x311   :  { %1375 = vmatpush3.bf16.msra.mxu0 %v1481_v54  ;;  %v986_v54 = vrot.slane %v1637_v32, %v985_v53 }
 0x312   :  { %1376 = vmatprep.subr.bf16.mxu0 %v1550_v1 }
 0x315   :  { %1377 = vmatpush3.bf16.msra.mxu0 %v1482_v55 }
 0x316   :  { %1402 = vmatprep.subr.bf16.mxu0 %v1550_v1 }
 0x3cb   :  { %v594_v37 = vpop.f32.mrb[8].mxu0 }
 0x3cc   :  { %v595_v38 = vadd.f32 %v594_v37, %v511_v36  ;;  %v1340_v39 = vpop.f32.mrb[9].mxu0 }
 0x3cd   :  { %v597_v40 = vpop.f32.mrb[10].mxu0 }
 0x3ce   :  { %v1126_v41 = vmul.f32 -1.442695, %v595_v38  ;;  %v1341_v42 = vpop.f32.mrb[11].mxu0 }
 0x3d0   :  { %1507 = vpow2.f32 %v1126_v41 }
 0x3da   :  { %v1508_v43 = vpop.eup %1507 }
 0x3db   :  { %v603_v44 = vadd.f32 1.0, %v1508_v43  ;;  %v1494_v43 = vld [vmem:[#allocation7 + $0x218] sm:$0xff]  }
 0x3dd   :  { %1509 = vrcp.f32 %v603_v44  ;;  %v1496_v44 = vld [vmem:[#allocation7 + $0x228] sm:$0xff]  }
 0x3e7   :  { %v1510_v45 = vpop.eup %1509 }
 0x3e8   :  { %v606_v46 = vmul.f32 %v1510_v45, %v595_v38  ;;  %v1497_v45 = vld [vmem:[#allocation7 + $0x230] sm:$0xff]  }
 0x3ea   :  { %v607_v47 = vpack.c.bf16 %v606_v46, %v606_v46  ;;  %v1498_v46 = vld [vmem:[#allocation7 + $0x238] sm:$0xff]  }
 0x3ec   :  { %1359 = vmatmul.mubr.bf16.vlgmr.msra.gmra.mrb[8].mxu1 %v607_v47 }
 0x3ed   :  { %1398 = vmatprep.mubr.msk.bf16.mxu1 %vm1551_vm0, %v1550_v1  ;;  %1383 = vmatpush3.bf16.msra.mxu1 %v1483_v8 }
 0x3ee   :  { %1384 = vmatprep.subr.bf16.mxu1 %v1550_v1 }
 0x3f1   :  { %1385 = vmatpush3.bf16.msra.mxu1 %v1484_v9 }
 0x3f2   :  { %1386 = vmatprep.subr.bf16.mxu1 %v1550_v1 }
 0x3f5   :  { %1387 = vmatpush3.bf16.msra.mxu1 %v1485_v10 }
 0x3f6   :  { %1388 = vmatprep.subr.bf16.mxu1 %v1550_v1 }
 0x3f9   :  { %1389 = vmatpush3.bf16.msra.mxu1 %v1486_v11 }
 0x3fa   :  { %1390 = vmatprep.subr.bf16.mxu1 %v1550_v1 }
 0x3fd   :  { %1391 = vmatpush3.bf16.msra.mxu1 %v1487_v12 }
 0x3fe   :  { %1392 = vmatprep.subr.bf16.mxu1 %v1550_v1 }
 0x401   :  { %1393 = vmatpush3.bf16.msra.mxu1 %v1488_v13 }
 0x402   :  { %1394 = vmatprep.subr.bf16.mxu1 %v1550_v1 }
 0x405   :  { %1395 = vmatpush3.bf16.msra.mxu1 %v1489_v14 }
 0x406   :  { %1396 = vmatprep.subr.bf16.mxu1 %v1550_v1 }
 0x409   :  { %1397 = vmatpush3.bf16.msra.mxu1 %v1490_v15 }
 0x4bf   :  { %v711_v58 = vpop.f32.mrb[8].mxu1 }
 0x4c0   :  { %v712_v59 = vadd.f32 %v711_v58, %v628_v57  ;;  %v1360_v60 = vpop.f32.mrb[9].mxu1 }
 0x4c1   :  { %v714_v61 = vpop.f32.mrb[10].mxu1 }
 0x4c2   :  { %v1135_v62 = vmul.f32 -1.442695, %v712_v59  ;;  %v1361_v63 = vpop.f32.mrb[11].mxu1 }
 0x4c4   :  { %1511 = vpow2.f32 %v1135_v62 }
 0x4ce   :  { %v1512_v0 = vpop.eup %1511 }
 0x4cf   :  { %v720_v2 = vadd.f32 1.0, %v1512_v0 }
 0x4d1   :  { %1513 = vrcp.f32 %v720_v2 }
 0x4db   :  { %v1514_v3 = vpop.eup %1513 }
 0x4dc   :  { %v723_v5 = vmul.f32 %v1514_v3, %v712_v59 }
 0x4de   :  { %v724_v6 = vpack.c.bf16 %v723_v5, %v723_v5 }
 0x4e0   :  { %1379 = vmatmul.mubr.bf16.vlgmr.msra.gmra.mrb[12].mxu0 %v724_v6 }
 0x4e1   :  { %1418 = vmatprep.mubr.msk.bf16.mxu0 %vm1551_vm0, %v1550_v1  ;;  %1403 = vmatpush3.bf16.msra.mxu0 %v1491_v29 }
 0x4e2   :  { %1404 = vmatprep.subr.bf16.mxu0 %v1550_v1 }
 0x4e5   :  { %1405 = vmatpush3.bf16.msra.mxu0 %v1492_v30 }
 0x4e6   :  { %1406 = vmatprep.subr.bf16.mxu0 %v1550_v1 }
 0x4e9   :  { %1407 = vmatpush3.bf16.msra.mxu0 %v1493_v31 }
 0x4ea   :  { %1408 = vmatprep.subr.bf16.mxu0 %v1550_v1 }
 0x4ed   :  { %1409 = vmatpush3.bf16.msra.mxu0 %v1494_v43 }
 0x4ee   :  { %1410 = vmatprep.subr.bf16.mxu0 %v1550_v1 }
 0x4f1   :  { %1411 = vmatpush3.bf16.msra.mxu0 %v1495_v4 }
 0x4f2   :  { %1412 = vmatprep.subr.bf16.mxu0 %v1550_v1 }
 0x4f5   :  { %1413 = vmatpush3.bf16.msra.mxu0 %v1496_v44 }
 0x4f6   :  { %1414 = vmatprep.subr.bf16.mxu0 %v1550_v1 }
 0x4f9   :  { %1415 = vmatpush3.bf16.msra.mxu0 %v1497_v45 }
 0x4fa   :  { %1416 = vmatprep.subr.bf16.mxu0 %v1550_v1 }
 0x4fd   :  { %1417 = vmatpush3.bf16.msra.mxu0 %v1498_v46 }
 0x5b3   :  { %v828_v18 = vpop.f32.mrb[12].mxu0 }
 0x5b4   :  { %v829_v19 = vadd.f32 %v828_v18, %v745_v17  ;;  %v1380_v20 = vpop.f32.mrb[13].mxu0 }
 0x5b5   :  { %v831_v21 = vpop.f32.mrb[14].mxu0 }
 0x5b6   :  { %v1144_v22 = vmul.f32 -1.442695, %v829_v19  ;;  %v1381_v23 = vpop.f32.mrb[15].mxu0 }
 0x5b8   :  { %1515 = vpow2.f32 %v1144_v22 }
 0x5c2   :  { %v1516_v24 = vpop.eup %1515 }
 0x5c3   :  { %v837_v25 = vadd.f32 1.0, %v1516_v24 }
 0x5c5   :  { %1517 = vrcp.f32 %v837_v25 }
 0x5cf   :  { %v1518_v26 = vpop.eup %1517 }
 0x5d0   :  { %v840_v27 = vmul.f32 %v1518_v26, %v829_v19 }
 0x5d2   :  { %v841_v28 = vpack.c.bf16 %v840_v27, %v840_v27 }
 0x5d4   :  { %1399 = vmatmul.mubr.bf16.vlgmr.msra.gmra.mrb[12].mxu1 %v841_v28 }
 0x6a7   :  { %v945_v36 = vpop.f32.mrb[12].mxu1 }
 0x6a8   :  { %v946_v38 = vadd.f32 %v945_v36, %v862_v35  ;;  %v1400_v39 = vpop.f32.mrb[13].mxu1 }
 0x6a9   :  { %v948_v40 = vpop.f32.mrb[14].mxu1 }
 0x6aa   :  { %v1401_v41 = vpop.f32.mrb[15].mxu1  ;;  %v958_v42 = vsel %vm1705_vm4, %v946_v38, -1e+30 }
 0x6ab   :  { %959 = vmax.xlane.f32.xlu0 %v958_v42 }
 0x738   :  { %v960_v47 = vpop.xlane.xlu0 %959 }
 0x739   :  { %v961_v48 = vsub.f32 %v946_v38, %v960_v47 }
 0x73b   :  { %v962_v49 = vsel %vm1705_vm4, %v961_v48, -1e+30 }
 0x73c   :  { %v963_v50 = vmul.f32 1.442695, %v962_v49 }
 0x73e   :  { %1519 = vpow2.f32 %v963_v50 }
 0x748   :  { %v1520_v51 = vpop.eup %1519 }
 0x749   :  { %v965_v52 = vpack.c.bf16 %v1520_v51, %v1520_v51 }
 0x74b   :  { %1419 = vmatmul.mubr.bf16.vlgmr.msra.gmra.mrb[16].mxu0 %v965_v52 }
 0x81e   :  { %v1069_v55 = vpop.f32.mrb[16].mxu0 }
 0x81f   :  { %v1070_v56 = vadd.f32 %v1069_v55, %v986_v54  ;;  %v1420_v57 = vpop.f32.mrb[17].mxu0 }
 0x820   :  { %v1072_v58 = vpop.f32.mrb[18].mxu0 }
 0x821   :  { %1521 = vrcp.f32 %v1070_v56  ;;  %v1421_v1 = vpop.f32.mrb[19].mxu0 }
 0x82b   :  { %v1522_v59 = vpop.eup %1521 }
 0x82c   :  { %v1076_v60 = vmul.f32 %v1522_v59, %v1520_v51 }
 0x82e   :  { %v1077_v61 = vsel %vm1705_vm4, %v1076_v60, %v946_v38 }
 0x82f   :  { %1078 = vst [vmem:[%s1728_s4] sm:$0xff] %v1077_v61 }
 0x830   :  { %1083 = vsyncpa [#allocation8], 1 }

</bundles_post_ra>
